<compile_context>
chip_gen: v5e
topology: v5e:2x2
jax: 0.10.0
libtpu: 0.0.40
codegen_flags: <defaults>
</compile_context>

<pallas_src>
import functools

import jax
import jax.numpy as jnp
from jax.experimental import pallas as pl
from jax.experimental.pallas import tpu as pltpu


def _cdiv(a, b):
    return -(-a // b)


def _round_up(v, m):
    return -(-v // m) * m


def _vmem_knobs():
    """Per-generation (VMEM budget, vmem_limit) in bytes; conservative if unknown."""
    cap = 0
    try:
        info = pltpu.get_tpu_info()
        cap = int(getattr(info, "vmem_capacity_bytes", 0) or 0)
    except Exception:
        cap = 0
    if cap >= 100 * 2**20:            # v5e / v6e: 128 MiB physical per TensorCore
        return 64 * 2**20, 96 * 2**20
    if cap > 0:                       # v7x-class: 64 MiB physical per TensorCore
        return 36 * 2**20, 48 * 2**20
    return 24 * 2**20, 32 * 2**20     # unknown backend: stay conservative


def _num_tensorcores():
    """Best-effort TensorCores-per-chip; defaults to 1 (v5e/v6e behavior)."""
    try:
        info = pltpu.get_tpu_info()
        for attr in ("num_cores", "core_count", "num_tensorcores", "tensorcore_count"):
            v = getattr(info, attr, None)
            if isinstance(v, int) and v > 0:
                return min(2, v)
    except Exception:
        pass
    return 1


def _amw_table_kernel(idx_ref, x_ref, deltas_ref, o_ref, *, use_clamping, use_mxu_gather):
    """Gather delta row per batch row (table resident in VMEM) + add (+ optional clamp).

    idx_ref:    (tb, 1)      int32  -- delta-set index per row of this batch tile
    x_ref:      (tb, D)      float  -- input representation tile
    deltas_ref: (n_sets, D)  float  -- whole delta table (single VMEM copy, untiled)
    o_ref:      (tb, D)      float  -- output tile
    """
    idx = idx_ref[...]                         # (tb, 1) int32
    x = x_ref[...].astype(jnp.float32)         # f32 accumulation, one cast at store
    n_sets = deltas_ref.shape[0]

    if use_mxu_gather:
        # One-hot gather rides the MXU slot (free in an HBM-bound kernel), keeps the
        # VALU budget small (~compare + add + clamp per element).
        tb = x_ref.shape[0]
        iota = jax.lax.broadcasted_iota(jnp.int32, (tb, n_sets), 1)
        onehot = (iota == idx).astype(deltas_ref.dtype)
        gathered = jnp.dot(onehot, deltas_ref[...], preferred_element_type=jnp.float32)
        out = x + gathered
    else:
        # Tiny table (<= 4 sets): unrolled VPU select-accumulate.
        out = x
        for s in range(n_sets):                # static, fully unrolled
            row = deltas_ref[pl.ds(s, 1), :].astype(jnp.float32)   # (1, D)
            out = jnp.where(idx == s, out + row, out)

    if use_clamping:
        out = jnp.clip(out, 0.0, 2.0)
    o_ref[...] = out.astype(o_ref.dtype)


def _amw_pregathered_kernel(x_ref, g_ref, o_ref, *, use_clamping):
    """Fallback path for tables too large for VMEM: deltas already gathered per row."""
    out = x_ref[...].astype(jnp.float32) + g_ref[...].astype(jnp.float32)
    if use_clamping:
        out = jnp.clip(out, 0.0, 2.0)
    o_ref[...] = out.astype(o_ref.dtype)


def add_modular_weights(in_repr, user_idxs, deltas, user_to_delta_set,
                        *, use_clamping=False, tile_b=1024,
                        vmem_budget_bytes=None, vmem_limit_bytes=None):
    """Pallas equivalent of AddModularWeights.forward.

    in_repr:           [B, D]            float
    user_idxs:         [B]               int32
    deltas:            [n_delta_sets, D] float (learned Δ parameter)
    user_to_delta_set: [n_users]         int32
    """
    B, D = in_repr.shape
    n_sets, d2 = deltas.shape
    assert d2 == D, "deltas last dim must equal latent_dim"

    out_dtype = jnp.promote_types(in_repr.dtype, deltas.dtype)   # match torch promotion
    x_item = jnp.dtype(in_repr.dtype).itemsize
    d_item = jnp.dtype(deltas.dtype).itemsize
    o_item = jnp.dtype(out_dtype).itemsize

    default_budget, default_limit = _vmem_knobs()
    if vmem_budget_bytes is None:
        vmem_budget_bytes = default_budget
    if vmem_limit_bytes is None:
        vmem_limit_bytes = default_limit

    # Glue: map user idx -> delta-set idx (pure index arithmetic in XLA). PyTorch would
    # raise on out-of-range; we clamp so the kernel never reads garbage rows.
    set_idx = jnp.clip(user_to_delta_set[user_idxs].astype(jnp.int32),
                       0, n_sets - 1).reshape(B, 1)

    # Sublane granularity of the (tile_b, D) blocks: 8 for 32-bit, 16 for bf16.
    sublane = max(8, 32 // max(1, x_item), 32 // max(1, o_item))

    # Per-row streamed VMEM: double-buffered x-in and out blocks + tiny idx block.
    per_row_stream = 2 * D * x_item + 2 * D * o_item + 2 * 4
    # Delta table: one copy in VMEM (untiled memory-space spec -> no double buffer).
    table_bytes = n_sets * D * d_item

    # Guard: if the table (at its resident size) doesn't fit alongside a minimal tile,
    # fall back to an XLA row-gather + streaming add kernel (stays mem-bound, VMEM-safe).
    pregather = table_bytes > max(0, vmem_budget_bytes - sublane * per_row_stream)
    if pregather:
        # TODO(synk): replace with an in-kernel DMA row gather (deltas in pl.ANY +
        # scalar-prefetched indices) to avoid the extra [B, D] HBM pass.
        per_row_stream += 2 * D * d_item
        table_bytes = 0

    # Mem-bound kernel: pick the biggest batch tile that fits the VMEM budget.
    max_rows = max(sublane, (vmem_budget_bytes - table_bytes) // per_row_stream)
    tb = min(tile_b, max_rows, _round_up(B, sublane))
    ncores = _num_tensorcores()
    if ncores > 1 and B > sublane:
        # Multi-TensorCore chip: keep >= 2 grid steps per core so the "parallel" axis
        # shards and per-core double buffering stays effective. Skipped on single-TC
        # chips (v5e/v6e) where extra grid steps are pure per-step overhead.
        tb = min(tb, max(sublane, _round_up(_cdiv(B, 2 * ncores), sublane)))
    tb = max(sublane, (tb // sublane) * sublane)
    grid_b = _cdiv(B, tb)   # last block may be partial; Pallas masks OOB rows on store.

    compiler_params = pltpu.CompilerParams(
        dimension_semantics=("parallel",),
        vmem_limit_bytes=int(vmem_limit_bytes))

    if pregather:
        gathered = jnp.take(deltas, set_idx[:, 0], axis=0)          # [B, D] in XLA
        kernel = functools.partial(_amw_pregathered_kernel, use_clamping=use_clamping)
        grid_spec = pltpu.PrefetchScalarGridSpec(
            num_scalar_prefetch=0, grid=(grid_b,),
            in_specs=[pl.BlockSpec((tb, D), lambda i: (i, 0)),
                      pl.BlockSpec((tb, D), lambda i: (i, 0))],
            out_specs=pl.BlockSpec((tb, D), lambda i: (i, 0)))
        cost = pl.CostEstimate(flops=2 * B * D, transcendentals=0,
                               bytes_accessed=B * D * (x_item + d_item + o_item))
        return pl.pallas_call(
            kernel, out_shape=jax.ShapeDtypeStruct((B, D), out_dtype),
            grid_spec=grid_spec, compiler_params=compiler_params,
            cost_estimate=cost)(in_repr, gathered)

    use_mxu_gather = n_sets > 4
    kernel = functools.partial(_amw_table_kernel, use_clamping=use_clamping,
                               use_mxu_gather=use_mxu_gather)

    # NOTE: for best performance D should be a multiple of 128 (lane-dense stores).
    grid_spec = pltpu.PrefetchScalarGridSpec(
        num_scalar_prefetch=0,
        grid=(grid_b,),
        in_specs=[
            pl.BlockSpec((tb, 1), lambda i: (i, 0)),            # per-row delta-set index
            pl.BlockSpec((tb, D), lambda i: (i, 0)),            # in_repr tile
            pl.BlockSpec(memory_space=pltpu.MemorySpace.VMEM),  # whole table, single copy
        ],
        out_specs=pl.BlockSpec((tb, D), lambda i: (i, 0)))

    flops = (2 * B * n_sets * D) if use_mxu_gather else (2 * B * D)
    bytes_accessed = (B * D * (x_item + o_item)   # read x, write out
                      + n_sets * D * d_item       # delta table read once
                      + B * 4)                    # indices

    return pl.pallas_call(
        kernel,
        out_shape=jax.ShapeDtypeStruct((B, D), out_dtype),
        grid_spec=grid_spec,
        compiler_params=compiler_params,
        cost_estimate=pl.CostEstimate(flops=flops, transcendentals=0,
                                      bytes_accessed=bytes_accessed),
    )(set_idx, in_repr, deltas)


if __name__ == "__main__":
    # Small deterministic setup consistent with the module's forward signature.
    B = 16              # batch_size
    D = 128             # latent_dim (multiple of 128 keeps stores lane-dense)
    n_users = 10
    init_std = 0.01

    key = jax.random.PRNGKey(0)
    k_x, k_d, k_u, k_i = jax.random.split(key, 4)

    in_repr = jax.random.normal(k_x, (B, D), dtype=jnp.float32)
    user_idxs = jax.random.randint(k_i, (B,), 0, n_users, dtype=jnp.int32)

    ok = True
    # (4, True) exercises the VPU select path; (9, False) exercises the MXU one-hot path.
    for n_delta_sets, use_clamping in ((4, True), (9, False)):
        deltas = init_std * jax.random.normal(k_d, (n_delta_sets, D), dtype=jnp.float32)
        user_to_delta_set = jnp.concatenate(
            [jnp.arange(n_delta_sets, dtype=jnp.int32),
             jax.random.randint(k_u, (n_users - n_delta_sets,), 0, n_delta_sets,
                                dtype=jnp.int32)])

        out = add_modular_weights(in_repr, user_idxs, deltas, user_to_delta_set,
                                  use_clamping=use_clamping)
        out = jax.block_until_ready(out)

        # Reference check in plain JAX (same semantics as the PyTorch forward).
        ref = in_repr + deltas[user_to_delta_set[user_idxs]]
        if use_clamping:
            ref = jnp.clip(ref, 0.0, 2.0)
        ok = ok and bool(jnp.allclose(out, ref, atol=1e-6))

    assert ok, "mismatch vs reference"
    print("KERNEL_OK")
</pallas_src>

<mosaic_0001>
module attributes {stable_mosaic.version = 11 : i64} {
  func.func @_amw_table_kernel(%arg0: i32, %arg1: memref<16x1xi32, #tpu.memory_space<vmem>>, %arg2: memref<16x128xf32, #tpu.memory_space<vmem>>, %arg3: memref<4x128xf32, #tpu.memory_space<vmem>>, %arg4: memref<16x128xf32, #tpu.memory_space<vmem>>) attributes {dimension_semantics = [#tpu.dimension_semantics<parallel>], iteration_bounds = array<i64: 1>, scalar_prefetch = 0 : i64, scratch_operands = 0 : i64, tpu.core_type = #tpu.core_type<tc>, window_params = [{transform_indices = @transform_0, window_bounds = array<i64: 16, 1>}, {transform_indices = @transform_1, window_bounds = array<i64: 16, 128>}, {pipeline_mode = #tpu.pipeline_mode<synchronous>, transform_indices = @transform_2, window_bounds = array<i64: 4, 128>}, {transform_indices = @transform_3, window_bounds = array<i64: 16, 128>}]} {
    %c0 = arith.constant 0 : index
    %c0_0 = arith.constant 0 : index
    %0 = vector.load %arg1[%c0, %c0_0] : memref<16x1xi32, #tpu.memory_space<vmem>>, vector<16x1xi32>
    %c0_1 = arith.constant 0 : index
    %c0_2 = arith.constant 0 : index
    %1 = vector.load %arg2[%c0_1, %c0_2] : memref<16x128xf32, #tpu.memory_space<vmem>>, vector<16x128xf32>
    %c0_3 = arith.constant 0 : index
    %c0_4 = arith.constant 0 : index
    %2 = vector.load %arg3[%c0_3, %c0_4] : memref<4x128xf32, #tpu.memory_space<vmem>>, vector<1x128xf32>
    %c0_i32 = arith.constant 0 : i32
    %3 = vector.broadcast %c0_i32 : i32 to vector<16x1xi32>
    %4 = arith.cmpi eq, %0, %3 : vector<16x1xi32>
    %5 = vector.broadcast %2 : vector<1x128xf32> to vector<16x128xf32>
    %6 = arith.addf %1, %5 : vector<16x128xf32>
    %7 = vector.shape_cast %4 : vector<16x1xi1> to vector<16x1xi1>
    %8 = vector.broadcast %7 : vector<16x1xi1> to vector<16x128xi1>
    %9 = arith.select %8, %6, %1 : vector<16x128xi1>, vector<16x128xf32>
    %c1 = arith.constant 1 : index
    %c0_5 = arith.constant 0 : index
    %10 = vector.load %arg3[%c1, %c0_5] : memref<4x128xf32, #tpu.memory_space<vmem>>, vector<1x128xf32>
    %c1_i32 = arith.constant 1 : i32
    %11 = vector.broadcast %c1_i32 : i32 to vector<16x1xi32>
    %12 = arith.cmpi eq, %0, %11 : vector<16x1xi32>
    %13 = vector.broadcast %10 : vector<1x128xf32> to vector<16x128xf32>
    %14 = arith.addf %9, %13 : vector<16x128xf32>
    %15 = vector.shape_cast %12 : vector<16x1xi1> to vector<16x1xi1>
    %16 = vector.broadcast %15 : vector<16x1xi1> to vector<16x128xi1>
    %17 = arith.select %16, %14, %9 : vector<16x128xi1>, vector<16x128xf32>
    %c2 = arith.constant 2 : index
    %c0_6 = arith.constant 0 : index
    %18 = vector.load %arg3[%c2, %c0_6] : memref<4x128xf32, #tpu.memory_space<vmem>>, vector<1x128xf32>
    %c2_i32 = arith.constant 2 : i32
    %19 = vector.broadcast %c2_i32 : i32 to vector<16x1xi32>
    %20 = arith.cmpi eq, %0, %19 : vector<16x1xi32>
    %21 = vector.broadcast %18 : vector<1x128xf32> to vector<16x128xf32>
    %22 = arith.addf %17, %21 : vector<16x128xf32>
    %23 = vector.shape_cast %20 : vector<16x1xi1> to vector<16x1xi1>
    %24 = vector.broadcast %23 : vector<16x1xi1> to vector<16x128xi1>
    %25 = arith.select %24, %22, %17 : vector<16x128xi1>, vector<16x128xf32>
    %c3 = arith.constant 3 : index
    %c0_7 = arith.constant 0 : index
    %26 = vector.load %arg3[%c3, %c0_7] : memref<4x128xf32, #tpu.memory_space<vmem>>, vector<1x128xf32>
    %c3_i32 = arith.constant 3 : i32
    %27 = vector.broadcast %c3_i32 : i32 to vector<16x1xi32>
    %28 = arith.cmpi eq, %0, %27 : vector<16x1xi32>
    %29 = vector.broadcast %26 : vector<1x128xf32> to vector<16x128xf32>
    %30 = arith.addf %25, %29 : vector<16x128xf32>
    %31 = vector.shape_cast %28 : vector<16x1xi1> to vector<16x1xi1>
    %32 = vector.broadcast %31 : vector<16x1xi1> to vector<16x128xi1>
    %33 = arith.select %32, %30, %25 : vector<16x128xi1>, vector<16x128xf32>
    %cst = arith.constant 0.000000e+00 : f32
    %cst_8 = arith.constant 2.000000e+00 : f32
    %34 = vector.broadcast %cst : f32 to vector<16x128xf32>
    %35 = arith.maximumf %34, %33 : vector<16x128xf32>
    %36 = vector.broadcast %cst_8 : f32 to vector<16x128xf32>
    %37 = arith.minimumf %36, %35 : vector<16x128xf32>
    %c0_9 = arith.constant 0 : index
    %c0_10 = arith.constant 0 : index
    %38 = vector.load %arg4[%c0_9, %c0_10] : memref<16x128xf32, #tpu.memory_space<vmem>>, vector<16x128xf32>
    tpu.vector_store %arg4[%c0_9, %c0_10], %37 {strides = array<i32>} : memref<16x128xf32, #tpu.memory_space<vmem>>, vector<16x128xf32>,
    return
  }
  func.func @transform_0(%arg0: i32) -> (i32, i32) {
    %c0_i32 = arith.constant 0 : i32
    %c0_i32_0 = arith.constant 0 : i32
    return %arg0, %c0_i32 : i32, i32
  }
  func.func @transform_1(%arg0: i32) -> (i32, i32) {
    %c0_i32 = arith.constant 0 : i32
    %c0_i32_0 = arith.constant 0 : i32
    return %arg0, %c0_i32 : i32, i32
  }
  func.func @transform_2(%arg0: i32) -> (i32, i32) {
    %c0_i32 = arith.constant 0 : i32
    %c0_i32_0 = arith.constant 0 : i32
    %c0_i32_1 = arith.constant 0 : i32
    return %c0_i32, %c0_i32_0 : i32, i32
  }
  func.func @transform_3(%arg0: i32) -> (i32, i32) {
    %c0_i32 = arith.constant 0 : i32
    %c0_i32_0 = arith.constant 0 : i32
    return %arg0, %c0_i32 : i32, i32
  }
}

</mosaic_0001>

<bundles_post_ra>
// kernel: tpu_custom_call.1
= control target key start
LH: loop header
LB: loop body
LE: loop exit
PB: predicated region body
PF: predicated region fallthrough
CT: control target
= control target key end

     0   :  { %8 = vsyncpa [#allocation3], 0  ;;  %s237_s0 = inlined_call_operand.vmem [shape: s32[16,1], index: 0, kind: input, shape index: {}]   ;;  %s238_s1 = inlined_call_operand.vmem [shape: f32[16,128], index: 1, kind: input, shape index: {}]   ;;  %s239_s2 = inlined_call_operand.hbm [shape: f32[4,128], index: 2, kind: input, shape index: {}]   ;;  %s240_s3 = inlined_call_operand.hbm [shape: f32[16,128], index: 3, kind: output, shape index: {}]  }
   0x1   :  { %9 = vsyncpa [#allocation4], 0  ;;  %s19_s14 = sshll.u32 %s239_s2, 4  ;;  %s194_s15 = smov [#allocation2]   ;;  %s20_s14 = int_to_ptr.hbm [resolvable:$true] %s19_s14 }
   0x2   :  { %s21_s16 = sshll.u32 %s194_s15, 4  ;;  %s22_s16 = int_to_ptr.vmem [resolvable:$true] %s21_s16 }
   0x3   :  { %24 = dma.hbm_to_vmem [thread:$0]  %s20_s14, 64, %s22_s16, [#allocation3]  }
   0x4   :  { %190 = dma.done.wait [#allocation3], 64  }
   0x5   :  { %191 = vsyncadd [#allocation3], 4294967232  ;;  %v195_v0 = vmov 0   ;;  %v29_v1 = vld [vmem:[%s237_s0] sm:$0xff]  ;;  %v30_v4 = vld [vmem:[%s237_s0 + $0x8] sm:$0xff]  ;;  %s117_s26 = sshll.u32 %s240_s3, 4  ;;  %s118_s26 = int_to_ptr.hbm [resolvable:$true] %s117_s26 }
   0x6   :  { %136 = vset.pattern.permute.xlu1 %v195_v0  ;;  %135 = vset.pattern.permute.xlu0 %v195_v0  ;;  %vm52_vm0 = vcmp.eq.s32.totalorder %v29_v1, 1  ;;  %vm34_vm1 = vcmp.eq.s32.totalorder %v29_v1, 0  ;;  %vm70_vm2 = vcmp.eq.s32.totalorder %v29_v1, 2  ;;  %vm53_vm3 = vcmp.eq.s32.totalorder %v30_v4, 1  ;;  %v138_v11 = vld [vmem:[#allocation2] ss:$0 sm:$0xff] }
   0x7   :  { %137 = vset.pattern.permute.xlu2 %v195_v0  ;;  %v57_v2 = vsel %vm52_vm0, 1, %v195_v0  ;;  %v39_v3 = vsel %vm34_vm1, 1, %v195_v0  ;;  %v75_v5 = vsel %vm70_vm2, 1, %v195_v0  ;;  %vm35_vm4 = vcmp.eq.s32.totalorder %v30_v4, 0  ;;  %v31_v12 = vld [vmem:[%s238_s1] sm:$0xff]  ;;  %v32_v20 = vld [vmem:[%s238_s1 + $0x8] sm:$0xff] }
   0x8   :  { %60 = vperm.xlu1 %136, %v57_v2   ;;  %42 = vperm.xlu0 %135, %v39_v3   ;;  %vm71_vm5 = vcmp.eq.s32.totalorder %v30_v4, 2  ;;  %v58_v6 = vsel %vm53_vm3, 1, %v195_v0  ;;  %v40_v7 = vsel %vm35_vm4, 1, %v195_v0  ;;  %vm89_vm6 = vcmp.eq.s32.totalorder %v30_v4, 3  ;;  %v139_v14 = vld [vmem:[#allocation2 + $0x1] ss:$0 sm:$0xff] }
   0x9   :  { %78 = vperm.xlu2 %137, %v75_v5   ;;  %v76_v8 = vsel %vm71_vm5, 1, %v195_v0  ;;  %vm88_vm7 = vcmp.eq.s32.totalorder %v29_v1, 3  ;;  %v94_v9 = vsel %vm89_vm6, 1, %v195_v0  ;;  %v37_v13 = vadd.f32 %v138_v11, %v31_v12  ;;  %v140_v21 = vld [vmem:[#allocation2 + $0x2] ss:$0 sm:$0xff]  ;;  %s196_s1 = smov [#allocation5]  }
   0xa   :  { %v93_v10 = vsel %vm88_vm7, 1, %v195_v0  ;;  %v38_v23 = vadd.f32 %v138_v11, %v32_v20  ;;  %v141_v30 = vld [vmem:[#allocation2 + $0x3] ss:$0 sm:$0xff]  ;;  %s115_s23 = sshll.u32 %s196_s1, 4  ;;  %s197_s27 = smov 128   ;;  %s116_s23 = int_to_ptr.vmem [resolvable:$true] %s115_s23 }
   0xb   :  { %s198_s28 = smov 8  }
  0x10   :  { %63 = vperm.xlu1 %136, %v58_v6   ;;  %45 = vperm.xlu0 %135, %v40_v7  }
  0x11   :  { %81 = vperm.xlu2 %137, %v76_v8  }
  0x18   :  { %99 = vperm.xlu1 %136, %v94_v9   ;;  %96 = vperm.xlu0 %135, %v93_v10  }
  0x63   :  { %v79_v17 = vpop.permute.xlu2 %78 }
  0x64   :  { %vm83_vm11 = vcmp.eq.s32.totalorder %v79_v17, 1 }
  0x6b   :  { %v82_v29 = vpop.permute.xlu2 %81 }
  0x6c   :  { %vm84_vm13 = vcmp.eq.s32.totalorder %v82_v29, 1 }
  0x7a   :  { %v61_v15 = vpop.permute.xlu1 %60  ;;  %v43_v16 = vpop.permute.xlu0 %42 }
  0x7b   :  { %vm47_vm8 = vcmp.eq.s32.totalorder %v43_v16, 1  ;;  %vm65_vm9 = vcmp.eq.s32.totalorder %v61_v15, 1 }
  0x7c   :  { %v49_v18 = vsel %vm47_vm8, %v37_v13, %v31_v12 }
  0x7d   :  { %v55_v19 = vadd.f32 %v139_v14, %v49_v18 }
  0x7f   :  { %v67_v22 = vsel %vm65_vm9, %v55_v19, %v49_v18 }
  0x80   :  { %v73_v26 = vadd.f32 %v140_v21, %v67_v22 }
  0x82   :  { %v64_v24 = vpop.permute.xlu1 %63  ;;  %v46_v25 = vpop.permute.xlu0 %45  ;;  %v85_v32 = vsel %vm83_vm11, %v73_v26, %v67_v22 }
  0x83   :  { %vm48_vm10 = vcmp.eq.s32.totalorder %v46_v25, 1  ;;  %vm66_vm12 = vcmp.eq.s32.totalorder %v64_v24, 1  ;;  %v91_v36 = vadd.f32 %v141_v30, %v85_v32 }
  0x84   :  { %v50_v27 = vsel %vm48_vm10, %v38_v23, %v32_v20 }
  0x85   :  { %v56_v28 = vadd.f32 %v139_v14, %v50_v27 }
  0x87   :  { %v68_v31 = vsel %vm66_vm12, %v56_v28, %v50_v27 }
  0x88   :  { %v74_v33 = vadd.f32 %v140_v21, %v68_v31 }
  0x8a   :  { %v100_v34 = vpop.permute.xlu1 %99  ;;  %v86_v35 = vsel %vm84_vm13, %v74_v33, %v68_v31  ;;  %v97_v37 = vpop.permute.xlu0 %96 }
  0x8b   :  { %v92_v38 = vadd.f32 %v141_v30, %v86_v35  ;;  %vm102_vm14 = vcmp.eq.s32.totalorder %v100_v34, 1  ;;  %vm101_vm15 = vcmp.eq.s32.totalorder %v97_v37, 1 }
  0x8c   :  { %v103_v39 = vsel %vm101_vm15, %v91_v36, %v85_v32 }
  0x8d   :  { %v104_v40 = vsel %vm102_vm14, %v92_v38, %v86_v35  ;;  %v105_v41 = vmax.f32 %v103_v39, 0.0 }
  0x8e   :  { %v106_v42 = vmax.f32 %v104_v40, 0.0 }
  0x8f   :  { %v107_v43 = vmin.f32 %v105_v41, 2.0 }
  0x90   :  { %v108_v44 = vmin.f32 %v106_v42, 2.0 }
  0x91   :  { %109 = vst [vmem:[#allocation5] sm:$0xff] %v107_v43 }
  0x92   :  { %110 = vst [vmem:[#allocation5 + $0x8] sm:$0xff] %v108_v44 }
  0x93   :  { %123 = dma.vmem_to_hbm [thread:$0]  %s116_s23, 256, %s118_s26, [#allocation4], %s197_s27, %s197_s27, %s198_s28  }
  0x94   :  { %192 = dma.done.wait [#allocation4], 256  }
  0x95   :  { %193 = vsyncadd [#allocation4], 4294967040 }
  0x96   :  { %128 = vsyncpa [#allocation3], 1 }
  0x97   :  { %129 = vsyncpa [#allocation4], 1 }

</bundles_post_ra>
